<compile_context>
chip_gen: v5e
topology: v5e:2x2
jax: 0.10.0
libtpu: 0.0.40
codegen_flags: <defaults>
</compile_context>

<pallas_src>
import functools
import inspect

import jax
import jax.numpy as jnp
from jax import lax
from jax.experimental import pallas as pl
from jax.experimental.pallas import tpu as pltpu


_SQRT_HALF = 0.7071067811865476  # 1/sqrt(2)


def _round_up(n, m):
    return ((n + m - 1) // m) * m


def _supports_pipeline_mode():
    if not hasattr(pl, "Buffered"):
        return False
    try:
        return "pipeline_mode" in inspect.signature(pl.BlockSpec).parameters
    except (TypeError, ValueError):
        return False


_HAS_PIPELINE_MODE = _supports_pipeline_mode()


def _gelu(x, approximate):
    if approximate:
        # tanh-approx GELU: the transcendental goes to the EUP slot, keeping
        # the MXU (not the VALU erf polynomial) as the binding unit.
        return jax.nn.gelu(x, approximate=True)
    # Exact erf GELU (torch nn.GELU() default numerics).
    return 0.5 * x * (1.0 + lax.erf(x * _SQRT_HALF))


def _vmem_budget_bytes():
    # ~80% of physical VMEM leaves headroom for Mosaic internal scratch:
    # ~51 MiB on v7x (64 MiB / TC), ~102 MiB on v5e / v6e (128 MiB).
    try:
        cap = int(pltpu.get_tpu_info().vmem_capacity_bytes)
    except Exception:
        cap = 64 * 2 ** 20  # conservative (v7x-sized) fallback
    return int(cap * 0.8)


def mlp_kernel(x_ref, w1_ref, b1_ref, w2_ref, b2_ref, o_ref, *, nk, th, approximate):
    # x_ref : (TM, Cin_p)     w1_ref: (Cin_p, H_p)   b1_ref: (1, H_p)   [f32]
    # w2_ref: (H_p, Cout_p)   b2_ref: (1, Cout_p)    o_ref : (TM, Cout_p)
    x = x_ref[...]

    def h_chunk(k, acc):
        off = k * th
        if not isinstance(off, int):
            off = pl.multiple_of(off, 128)
        # fc1 chunk (+bias) + GELU, accumulate/activate in f32.
        h = jnp.dot(x, w1_ref[:, pl.ds(off, th)], preferred_element_type=jnp.float32)
        h = _gelu(h + b1_ref[:, pl.ds(off, th)], approximate)
        # Dropout(p=0.0) is the identity -> no-op.
        return acc + jnp.dot(
            h.astype(w2_ref.dtype),
            w2_ref[pl.ds(off, th), :],
            preferred_element_type=jnp.float32,
        )

    zero = jnp.zeros((x.shape[0], o_ref.shape[-1]), jnp.float32)
    if nk == 1:
        acc = h_chunk(0, zero)
    else:
        acc = lax.fori_loop(0, nk, h_chunk, zero, unroll=(nk <= 8))
    o_ref[...] = (acc + b2_ref[...]).astype(o_ref.dtype)


def prepare_mlp_params(w1, b1, w2, b2, *, param_dtype=None, th_max=512):
    """Pad (and optionally cast) the Linear parameters ONCE, at init time.

    w1: (Cin, H)  b1: (H,)  w2: (H, Cout)  b2: (Cout,)
    (i.e. the transpose of torch's (out, in) weight layout, so the kernel
    computes x @ W == x @ weight.T in torch terms).
    """
    Cin, H = w1.shape
    H2, Cout = w2.shape
    assert H == H2 and b1.shape == (H,) and b2.shape == (Cout,)

    if param_dtype is not None:
        w1 = w1.astype(param_dtype)
        w2 = w2.astype(param_dtype)

    # Hidden-dim chunk: multiple of 128, capped, so the in-kernel f32 GELU
    # intermediate is (TM, TH) instead of (TM, H).
    th = min(_round_up(H, 128), _round_up(th_max, 128))
    Cin_p = _round_up(Cin, 128)
    H_p = _round_up(H, th)
    Cout_p = _round_up(Cout, 128)

    w1_p = w1 if (Cin_p, H_p) == (Cin, H) else jnp.pad(
        w1, ((0, Cin_p - Cin), (0, H_p - H)))
    w2_p = w2 if (H_p, Cout_p) == (H, Cout) else jnp.pad(
        w2, ((0, H_p - H), (0, Cout_p - Cout)))
    # Biases kept in f32 so the adds land on the f32 accumulator.
    b1_p = jnp.pad(b1.astype(jnp.float32), (0, H_p - H)).reshape(1, H_p)
    b2_p = jnp.pad(b2.astype(jnp.float32), (0, Cout_p - Cout)).reshape(1, Cout_p)

    return dict(w1=w1_p, b1=b1_p, w2=w2_p, b2=b2_p,
                cin=Cin, hidden=H, cout=Cout, th=th)


def mlp_pallas(x, params, *, approximate_gelu=True):
    """x: (..., Cin) (HAT uses (B, N, C)).  Returns (..., Cout).

    Matches torch Mlp.forward with drop=0.0.  approximate_gelu=True uses the
    tanh GELU (EUP-friendly); pass False for torch's exact erf GELU.
    """
    Cin, H, Cout = params["cin"], params["hidden"], params["cout"]
    th = params["th"]
    w1, b1, w2, b2 = params["w1"], params["b1"], params["w2"], params["b2"]
    Cin_p, H_p = w1.shape
    _, Cout_p = w2.shape
    nk = H_p // th

    lead_shape = x.shape[:-1]
    assert x.shape[-1] == Cin
    M = 1
    for d in lead_shape:
        M *= int(d)

    out_dtype = x.dtype
    # Cast activations to the (possibly bf16) weight dtype: bf16 inputs run the
    # MXU in a single pass (f32 is emulated with several slower passes).
    x2d = x.reshape(M, Cin).astype(w1.dtype)
    if Cin_p != Cin:
        # Only the reduction dim is zero-padded (no token-dim padding pass).
        x2d = jnp.pad(x2d, ((0, 0), (0, Cin_p - Cin)))

    x_item = jnp.dtype(x2d.dtype).itemsize
    w_item = jnp.dtype(w1.dtype).itemsize
    o_item = jnp.dtype(out_dtype).itemsize

    # --- Token tile size ----------------------------------------------------
    TM = 1024 if w_item < 4 else 512
    # Keep the 1-D "parallel" grid long enough to shard across 2 TCs (v7x
    # megacore) and still pipeline the x / out DMAs.
    while TM > 256 and pl.cdiv(M, TM) < 4:
        TM //= 2

    budget = _vmem_budget_bytes()
    resident = (Cin_p * H_p + H_p * Cout_p) * w_item + (H_p + Cout_p) * 4
    # Per-token-row VMEM: double-buffered x & out tiles + f32 hidden chunk +
    # f32 accumulator.
    row_bytes = 2 * Cin_p * x_item + 2 * Cout_p * o_item + (th + Cout_p) * 4
    avail = budget - resident - (2 << 20)
    if avail > 0:
        TM = min(TM, max(8, (avail // row_bytes) // 8 * 8))
    # TODO(synk): if the weights themselves exceed the VMEM budget they should
    # be streamed in H-chunks via a second ("arbitrary") grid axis instead of
    # being held resident.
    TM = max(8, min(TM, _round_up(M, 8)))

    grid = (pl.cdiv(M, TM),)

    cost = pl.CostEstimate(
        flops=2 * M * (Cin_p * H_p + H_p * Cout_p),
        transcendentals=M * H_p,
        bytes_accessed=(
            M * (Cin_p * x_item + Cout_p * o_item)          # activations in/out
            + (Cin_p * H_p + H_p * Cout_p) * w_item         # weights (read once)
            + (H_p + Cout_p) * 4                            # biases
        ),
    )

    kernel = functools.partial(mlp_kernel, nk=nk, th=th, approximate=approximate_gelu)

    def _run(single_buffer_weights):
        if single_buffer_weights:
            def wspec(shape):
                return pl.BlockSpec(shape, lambda i: (0,) * len(shape),
                                    pipeline_mode=pl.Buffered(1))
        else:
            def wspec(shape):
                return pl.BlockSpec(shape, lambda i: (0,) * len(shape))

        return pl.pallas_call(
            kernel,
            out_shape=jax.ShapeDtypeStruct((M, Cout_p), out_dtype),
            grid_spec=pltpu.PrefetchScalarGridSpec(
                num_scalar_prefetch=0,
                grid=grid,
                in_specs=[
                    pl.BlockSpec((TM, Cin_p), lambda i: (i, 0)),  # streamed x tile
                    wspec((Cin_p, H_p)),                          # w1 (resident)
                    wspec((1, H_p)),                              # b1 (resident)
                    wspec((H_p, Cout_p)),                         # w2 (resident)
                    wspec((1, Cout_p)),                           # b2 (resident)
                ],
                out_specs=pl.BlockSpec((TM, Cout_p), lambda i: (i, 0)),
            ),
            compiler_params=pltpu.CompilerParams(
                dimension_semantics=("parallel",),  # token tiles are independent
                vmem_limit_bytes=budget,
            ),
            cost_estimate=cost,
        )(x2d, w1, b1, w2, b2)

    if _HAS_PIPELINE_MODE:
        try:
            out2d = _run(True)
        except Exception:
            out2d = _run(False)   # fall back if Buffered(1) is rejected
    else:
        out2d = _run(False)

    # Slice off the lane padding on the output features.
    return out2d[:, :Cout].reshape(*lead_shape, Cout)


def init_mlp_params(key, in_features, hidden_features, out_features, dtype=jnp.float32):
    """Deterministic init mimicking nn.Linear's kaiming-uniform-ish bounds."""
    k1, k2, k3, k4 = jax.random.split(key, 4)
    bound1 = 1.0 / (in_features ** 0.5)
    bound2 = 1.0 / (hidden_features ** 0.5)
    w1 = jax.random.uniform(k1, (in_features, hidden_features), dtype, -bound1, bound1)
    b1 = jax.random.uniform(k2, (hidden_features,), dtype, -bound1, bound1)
    w2 = jax.random.uniform(k3, (hidden_features, out_features), dtype, -bound2, bound2)
    b2 = jax.random.uniform(k4, (out_features,), dtype, -bound2, bound2)
    return w1, b1, w2, b2


if __name__ == "__main__":
    key = jax.random.PRNGKey(0)
    kx, kp = jax.random.split(key)

    B, N = 2, 8            # batch, tokens
    in_features = 32
    hidden_features = 64   # e.g. mlp_ratio = 2
    out_features = 32

    x = jax.random.normal(kx, (B, N, in_features), dtype=jnp.float32)
    w1, b1, w2, b2 = init_mlp_params(kp, in_features, hidden_features, out_features)

    # Pad / cast the parameters once (not per forward call).
    params = prepare_mlp_params(w1, b1, w2, b2)

    # Default path: tanh-approx GELU (EUP slot).
    out = jax.block_until_ready(mlp_pallas(x, params))
    ref_tanh = jax.nn.gelu(x @ w1 + b1, approximate=True) @ w2 + b2
    assert out.shape == (B, N, out_features)
    assert jnp.allclose(out, ref_tanh, atol=1e-5, rtol=1e-5)

    # Exact-erf GELU path (torch nn.GELU() default numerics).
    out_exact = jax.block_until_ready(mlp_pallas(x, params, approximate_gelu=False))
    ref_erf = jax.nn.gelu(x @ w1 + b1, approximate=False) @ w2 + b2
    assert jnp.allclose(out_exact, ref_erf, atol=1e-5, rtol=1e-5)

    # bf16 weights/activations (single-pass MXU); looser tolerance expected.
    params_bf16 = prepare_mlp_params(w1, b1, w2, b2, param_dtype=jnp.bfloat16)
    out_bf16 = jax.block_until_ready(mlp_pallas(x, params_bf16))
    assert jnp.allclose(out_bf16, ref_tanh, atol=1e-1, rtol=1e-1)

    print("KERNEL_OK")
</pallas_src>

<mosaic_0001>
module attributes {stable_mosaic.version = 11 : i64} {
  func.func @mlp_kernel(%arg0: i32, %arg1: memref<16x128xf32, #tpu.memory_space<vmem>>, %arg2: memref<128x128xf32, #tpu.memory_space<vmem>>, %arg3: memref<1x128xf32, #tpu.memory_space<vmem>>, %arg4: memref<128x128xf32, #tpu.memory_space<vmem>>, %arg5: memref<1x128xf32, #tpu.memory_space<vmem>>, %arg6: memref<16x128xf32, #tpu.memory_space<vmem>>) attributes {dimension_semantics = [#tpu.dimension_semantics<parallel>], iteration_bounds = array<i64: 1>, scalar_prefetch = 0 : i64, scratch_operands = 0 : i64, tpu.core_type = #tpu.core_type<tc>, window_params = [{transform_indices = @transform_0, window_bounds = array<i64: 16, 128>}, {pipeline_mode = #tpu.pipeline_mode<synchronous>, transform_indices = @transform_1, window_bounds = array<i64: 128, 128>}, {pipeline_mode = #tpu.pipeline_mode<synchronous>, transform_indices = @transform_2, window_bounds = array<i64: 1, 128>}, {pipeline_mode = #tpu.pipeline_mode<synchronous>, transform_indices = @transform_3, window_bounds = array<i64: 128, 128>}, {pipeline_mode = #tpu.pipeline_mode<synchronous>, transform_indices = @transform_4, window_bounds = array<i64: 1, 128>}, {transform_indices = @transform_5, window_bounds = array<i64: 16, 128>}]} {
    %c0 = arith.constant 0 : index
    %c0_0 = arith.constant 0 : index
    %0 = vector.load %arg1[%c0, %c0_0] : memref<16x128xf32, #tpu.memory_space<vmem>>, vector<16x128xf32>
    %cst = arith.constant 0.000000e+00 : f32
    %1 = vector.broadcast %cst : f32 to vector<16x128xf32>
    %c0_1 = arith.constant 0 : index
    %c0_2 = arith.constant 0 : index
    %2 = vector.load %arg2[%c0_1, %c0_2] : memref<128x128xf32, #tpu.memory_space<vmem>>, vector<128x128xf32>
    %cst_3 = arith.constant dense<0.000000e+00> : vector<16x128xf32>
    %3 = tpu.matmul %0, %2, %cst_3 {dimension_numbers = #tpu.dot_dimension_numbers<[1], [0], [0], [1], [0, 0, 1, 1], [], []>} : vector<16x128xf32>, vector<128x128xf32>, vector<16x128xf32> -> vector<16x128xf32>
    %c0_4 = arith.constant 0 : index
    %c0_5 = arith.constant 0 : index
    %4 = vector.load %arg3[%c0_4, %c0_5] : memref<1x128xf32, #tpu.memory_space<vmem>>, vector<1x128xf32>
    %5 = vector.broadcast %4 : vector<1x128xf32> to vector<16x128xf32>
    %6 = arith.addf %3, %5 : vector<16x128xf32>
    %7 = arith.mulf %6, %6 : vector<16x128xf32>
    %8 = arith.mulf %6, %7 : vector<16x128xf32>
    %cst_6 = arith.constant 4.471500e-02 : f32
    %9 = vector.broadcast %cst_6 : f32 to vector<16x128xf32>
    %10 = arith.mulf %9, %8 : vector<16x128xf32>
    %11 = arith.addf %6, %10 : vector<16x128xf32>
    %cst_7 = arith.constant 0.797884583 : f32
    %12 = vector.broadcast %cst_7 : f32 to vector<16x128xf32>
    %13 = arith.mulf %12, %11 : vector<16x128xf32>
    %14 = math.tanh %13 : vector<16x128xf32>
    %cst_8 = arith.constant 1.000000e+00 : f32
    %15 = vector.broadcast %cst_8 : f32 to vector<16x128xf32>
    %16 = arith.addf %15, %14 : vector<16x128xf32>
    %cst_9 = arith.constant 5.000000e-01 : f32
    %17 = vector.broadcast %cst_9 : f32 to vector<16x128xf32>
    %18 = arith.mulf %17, %16 : vector<16x128xf32>
    %19 = arith.mulf %6, %18 : vector<16x128xf32>
    %c0_10 = arith.constant 0 : index
    %c0_11 = arith.constant 0 : index
    %20 = vector.load %arg4[%c0_10, %c0_11] : memref<128x128xf32, #tpu.memory_space<vmem>>, vector<128x128xf32>
    %cst_12 = arith.constant dense<0.000000e+00> : vector<16x128xf32>
    %21 = tpu.matmul %19, %20, %cst_12 {dimension_numbers = #tpu.dot_dimension_numbers<[1], [0], [0], [1], [0, 0, 1, 1], [], []>} : vector<16x128xf32>, vector<128x128xf32>, vector<16x128xf32> -> vector<16x128xf32>
    %22 = arith.addf %1, %21 : vector<16x128xf32>
    %c0_13 = arith.constant 0 : index
    %c0_14 = arith.constant 0 : index
    %23 = vector.load %arg5[%c0_13, %c0_14] : memref<1x128xf32, #tpu.memory_space<vmem>>, vector<1x128xf32>
    %24 = vector.broadcast %23 : vector<1x128xf32> to vector<16x128xf32>
    %25 = arith.addf %22, %24 : vector<16x128xf32>
    %c0_15 = arith.constant 0 : index
    %c0_16 = arith.constant 0 : index
    %26 = vector.load %arg6[%c0_15, %c0_16] : memref<16x128xf32, #tpu.memory_space<vmem>>, vector<16x128xf32>
    tpu.vector_store %arg6[%c0_15, %c0_16], %25 {strides = array<i32>} : memref<16x128xf32, #tpu.memory_space<vmem>>, vector<16x128xf32>,
    return
  }
  func.func @transform_0(%arg0: i32) -> (i32, i32) {
    %c0_i32 = arith.constant 0 : i32
    %c0_i32_0 = arith.constant 0 : i32
    return %arg0, %c0_i32 : i32, i32
  }
  func.func @transform_1(%arg0: i32) -> (i32, i32) {
    %c0_i32 = arith.constant 0 : i32
    %c0_i32_0 = arith.constant 0 : i32
    %c0_i32_1 = arith.constant 0 : i32
    return %c0_i32, %c0_i32_0 : i32, i32
  }
  func.func @transform_2(%arg0: i32) -> (i32, i32) {
    %c0_i32 = arith.constant 0 : i32
    %c0_i32_0 = arith.constant 0 : i32
    %c0_i32_1 = arith.constant 0 : i32
    return %c0_i32, %c0_i32_0 : i32, i32
  }
  func.func @transform_3(%arg0: i32) -> (i32, i32) {
    %c0_i32 = arith.constant 0 : i32
    %c0_i32_0 = arith.constant 0 : i32
    %c0_i32_1 = arith.constant 0 : i32
    return %c0_i32, %c0_i32_0 : i32, i32
  }
  func.func @transform_4(%arg0: i32) -> (i32, i32) {
    %c0_i32 = arith.constant 0 : i32
    %c0_i32_0 = arith.constant 0 : i32
    %c0_i32_1 = arith.constant 0 : i32
    return %c0_i32, %c0_i32_0 : i32, i32
  }
  func.func @transform_5(%arg0: i32) -> (i32, i32) {
    %c0_i32 = arith.constant 0 : i32
    %c0_i32_0 = arith.constant 0 : i32
    return %arg0, %c0_i32 : i32, i32
  }
}

module attributes {stable_mosaic.version = 11 : i64} {
  func.func @mlp_kernel(%arg0: i32, %arg1: memref<16x128xf32, #tpu.memory_space<vmem>>, %arg2: memref<128x128xf32, #tpu.memory_space<vmem>>, %arg3: memref<1x128xf32, #tpu.memory_space<vmem>>, %arg4: memref<128x128xf32, #tpu.memory_space<vmem>>, %arg5: memref<1x128xf32, #tpu.memory_space<vmem>>, %arg6: memref<16x128xf32, #tpu.memory_space<vmem>>) attributes {dimension_semantics = [#tpu.dimension_semantics<parallel>], iteration_bounds = array<i64: 1>, scalar_prefetch = 0 : i64, scratch_operands = 0 : i64, tpu.core_type = #tpu.core_type<tc>, window_params = [{transform_indices = @transform_0, window_bounds = array<i64: 16, 128>}, {pipeline_mode = #tpu.pipeline_mode<synchronous>, transform_indices = @transform_1, window_bounds = array<i64: 128, 128>}, {pipeline_mode = #tpu.pipeline_mode<synchronous>, transform_indices = @transform_2, window_bounds = array<i64: 1, 128>}, {pipeline_mode = #tpu.pipeline_mode<synchronous>, transform_indices = @transform_3, window_bounds = array<i64: 128, 128>}, {pipeline_mode = #tpu.pipeline_mode<synchronous>, transform_indices = @transform_4, window_bounds = array<i64: 1, 128>}, {transform_indices = @transform_5, window_bounds = array<i64: 16, 128>}]} {
    %c0 = arith.constant 0 : index
    %c0_0 = arith.constant 0 : index
    %0 = vector.load %arg1[%c0, %c0_0] : memref<16x128xf32, #tpu.memory_space<vmem>>, vector<16x128xf32>
    %cst = arith.constant 0.000000e+00 : f32
    %1 = vector.broadcast %cst : f32 to vector<16x128xf32>
    %c0_1 = arith.constant 0 : index
    %c0_2 = arith.constant 0 : index
    %2 = vector.load %arg2[%c0_1, %c0_2] : memref<128x128xf32, #tpu.memory_space<vmem>>, vector<128x128xf32>
    %cst_3 = arith.constant dense<0.000000e+00> : vector<16x128xf32>
    %3 = tpu.matmul %0, %2, %cst_3 {dimension_numbers = #tpu.dot_dimension_numbers<[1], [0], [0], [1], [0, 0, 1, 1], [], []>} : vector<16x128xf32>, vector<128x128xf32>, vector<16x128xf32> -> vector<16x128xf32>
    %c0_4 = arith.constant 0 : index
    %c0_5 = arith.constant 0 : index
    %4 = vector.load %arg3[%c0_4, %c0_5] : memref<1x128xf32, #tpu.memory_space<vmem>>, vector<1x128xf32>
    %5 = vector.broadcast %4 : vector<1x128xf32> to vector<16x128xf32>
    %6 = arith.addf %3, %5 : vector<16x128xf32>
    %7 = arith.mulf %6, %6 : vector<16x128xf32>
    %8 = arith.mulf %6, %7 : vector<16x128xf32>
    %cst_6 = arith.constant 4.471500e-02 : f32
    %9 = vector.broadcast %cst_6 : f32 to vector<16x128xf32>
    %10 = arith.mulf %9, %8 : vector<16x128xf32>
    %11 = arith.addf %6, %10 : vector<16x128xf32>
    %cst_7 = arith.constant 0.797884583 : f32
    %12 = vector.broadcast %cst_7 : f32 to vector<16x128xf32>
    %13 = arith.mulf %12, %11 : vector<16x128xf32>
    %14 = math.tanh %13 : vector<16x128xf32>
    %cst_8 = arith.constant 1.000000e+00 : f32
    %15 = vector.broadcast %cst_8 : f32 to vector<16x128xf32>
    %16 = arith.addf %15, %14 : vector<16x128xf32>
    %cst_9 = arith.constant 5.000000e-01 : f32
    %17 = vector.broadcast %cst_9 : f32 to vector<16x128xf32>
    %18 = arith.mulf %17, %16 : vector<16x128xf32>
    %19 = arith.mulf %6, %18 : vector<16x128xf32>
    %c0_10 = arith.constant 0 : index
    %c0_11 = arith.constant 0 : index
    %20 = vector.load %arg4[%c0_10, %c0_11] : memref<128x128xf32, #tpu.memory_space<vmem>>, vector<128x128xf32>
    %cst_12 = arith.constant dense<0.000000e+00> : vector<16x128xf32>
    %21 = tpu.matmul %19, %20, %cst_12 {dimension_numbers = #tpu.dot_dimension_numbers<[1], [0], [0], [1], [0, 0, 1, 1], [], []>} : vector<16x128xf32>, vector<128x128xf32>, vector<16x128xf32> -> vector<16x128xf32>
    %22 = arith.addf %1, %21 : vector<16x128xf32>
    %c0_13 = arith.constant 0 : index
    %c0_14 = arith.constant 0 : index
    %23 = vector.load %arg5[%c0_13, %c0_14] : memref<1x128xf32, #tpu.memory_space<vmem>>, vector<1x128xf32>
    %24 = vector.broadcast %23 : vector<1x128xf32> to vector<16x128xf32>
    %25 = arith.addf %22, %24 : vector<16x128xf32>
    %c0_15 = arith.constant 0 : index
    %c0_16 = arith.constant 0 : index
    %26 = vector.load %arg6[%c0_15, %c0_16] : memref<16x128xf32, #tpu.memory_space<vmem>>, vector<16x128xf32>
    tpu.vector_store %arg6[%c0_15, %c0_16], %25 {strides = array<i32>} : memref<16x128xf32, #tpu.memory_space<vmem>>, vector<16x128xf32>,
    return
  }
  func.func @transform_0(%arg0: i32) -> (i32, i32) {
    %c0_i32 = arith.constant 0 : i32
    %c0_i32_0 = arith.constant 0 : i32
    return %arg0, %c0_i32 : i32, i32
  }
  func.func @transform_1(%arg0: i32) -> (i32, i32) {
    %c0_i32 = arith.constant 0 : i32
    %c0_i32_0 = arith.constant 0 : i32
    %c0_i32_1 = arith.constant 0 : i32
    return %c0_i32, %c0_i32_0 : i32, i32
  }
  func.func @transform_2(%arg0: i32) -> (i32, i32) {
    %c0_i32 = arith.constant 0 : i32
    %c0_i32_0 = arith.constant 0 : i32
    %c0_i32_1 = arith.constant 0 : i32
    return %c0_i32, %c0_i32_0 : i32, i32
  }
  func.func @transform_3(%arg0: i32) -> (i32, i32) {
    %c0_i32 = arith.constant 0 : i32
    %c0_i32_0 = arith.constant 0 : i32
    %c0_i32_1 = arith.constant 0 : i32
    return %c0_i32, %c0_i32_0 : i32, i32
  }
  func.func @transform_4(%arg0: i32) -> (i32, i32) {
    %c0_i32 = arith.constant 0 : i32
    %c0_i32_0 = arith.constant 0 : i32
    %c0_i32_1 = arith.constant 0 : i32
    return %c0_i32, %c0_i32_0 : i32, i32
  }
  func.func @transform_5(%arg0: i32) -> (i32, i32) {
    %c0_i32 = arith.constant 0 : i32
    %c0_i32_0 = arith.constant 0 : i32
    return %arg0, %c0_i32 : i32, i32
  }
}

</mosaic_0001>

<bundles_post_ra>
// kernel: tpu_custom_call.1
= control target key start
LH: loop header
LB: loop body
LE: loop exit
PB: predicated region body
PF: predicated region fallthrough
CT: control target
= control target key end

     0   :  { %10 = vsyncpa [#allocation3], 0  ;;  %s408_s0 = inlined_call_operand.hbm [shape: f32[16,128], index: 0, kind: input, shape index: {}]   ;;  %s409_s1 = inlined_call_operand.hbm [shape: f32[128,128], index: 1, kind: input, shape index: {}]   ;;  %s410_s2 = inlined_call_operand.vmem [shape: f32[1,128], index: 2, kind: input, shape index: {}]   ;;  %s411_s3 = inlined_call_operand.hbm [shape: f32[128,128], index: 3, kind: input, shape index: {}]   ;;  %s412_s4 = inlined_call_operand.vmem [shape: f32[1,128], index: 4, kind: input, shape index: {}]   ;;  %s413_s5 = inlined_call_operand.hbm [shape: f32[16,128], index: 5, kind: output, shape index: {}]  }
   0x1   :  { %11 = vsyncpa [#allocation6], 0 }
   0x2   :  { %12 = vsyncpa [#allocation4], 0  ;;  %s30_s20 = sshll.u32 %s409_s1, 4  ;;  %s342_s21 = smov [#allocation5]   ;;  %s31_s20 = int_to_ptr.hbm [resolvable:$true] %s30_s20 }
   0x3   :  { %s32_s22 = sshll.u32 %s342_s21, 4  ;;  %s17_s25 = sshll.u32 %s408_s0, 4  ;;  %s33_s22 = int_to_ptr.vmem [resolvable:$true] %s32_s22  ;;  %s18_s25 = int_to_ptr.hbm [resolvable:$true] %s17_s25 }
   0x4   :  { %s343_s26 = smov 128   ;;  %s344_s27 = smov 8  }
   0x5   :  { %38 = dma.hbm_to_vmem [thread:$0]  %s31_s20, 2048, %s33_s22, [#allocation6], %s343_s26, %s343_s26, %s344_s27  }
   0x6   :  { %s345_s28 = smov [#allocation2]   ;;  %s45_s1 = sshll.u32 %s411_s3, 4  ;;  %s46_s1 = int_to_ptr.hbm [resolvable:$true] %s45_s1 }
   0x7   :  { %s19_s29 = sshll.u32 %s345_s28, 4  ;;  %s346_s0 = smov [#allocation7]   ;;  %s20_s29 = int_to_ptr.vmem [resolvable:$true] %s19_s29 }
   0x8   :  { %25 = dma.hbm_to_vmem [thread:$0]  %s18_s25, 256, %s20_s29, [#allocation3], %s343_s26, %s343_s26, %s344_s27  }
   0x9   :  { %s47_s7 = sshll.u32 %s346_s0, 4  ;;  %s48_s7 = int_to_ptr.vmem [resolvable:$true] %s47_s7 }
   0xa   :  { %53 = dma.hbm_to_vmem [thread:$0]  %s46_s1, 2048, %s48_s7, [#allocation6], %s343_s26, %s343_s26, %s344_s27  }
   0xb   :  { %336 = dma.done.wait [#allocation3], 256  }
   0xc   :  { %337 = vsyncadd [#allocation3], 4294967040 }
   0xd   :  { %338 = dma.done.wait [#allocation6], 4096  }
   0xe   :  { %339 = vsyncadd [#allocation6], 4294963200  ;;  %v85_v0 = vld [vmem:[#allocation5 + $0x78] sm:$0xff]  ;;  %v84_v1 = vld [vmem:[#allocation5 + $0x70] sm:$0xff]  ;;  %s347_s10 = smov [#allocation8]   ;;  %s182_s14 = sshll.u32 %s413_s5, 4  ;;  %s183_s14 = int_to_ptr.hbm [resolvable:$true] %s182_s14 }
   0xf   :  { %90 = vmatpush.msra.mxu0 %v85_v0  ;;  %196 = vmatpush.msra.mxu2 %v85_v0  ;;  %v83_v2 = vld [vmem:[#allocation5 + $0x68] sm:$0xff]  ;;  %v82_v3 = vld [vmem:[#allocation5 + $0x60] sm:$0xff]  ;;  %v81_v4 = vld [vmem:[#allocation5 + $0x58] sm:$0xff]  ;;  %s180_s11 = sshll.u32 %s347_s10, 4  ;;  %s181_s11 = int_to_ptr.vmem [resolvable:$true] %s180_s11 }
  0x10   :  { %v146_v5 = vld [vmem:[#allocation7 + $0x78] sm:$0xff]  ;;  %v145_v6 = vld [vmem:[#allocation7 + $0x70] sm:$0xff]  ;;  %v144_v8 = vld [vmem:[#allocation7 + $0x68] sm:$0xff] }
  0x11   :  { %91 = vmatpush.msra.mxu0 %v84_v1  ;;  %197 = vmatpush.msra.mxu2 %v84_v1  ;;  %v80_v7 = vld [vmem:[#allocation5 + $0x50] sm:$0xff]  ;;  %v79_v9 = vld [vmem:[#allocation5 + $0x48] sm:$0xff]  ;;  %v78_v10 = vld [vmem:[#allocation5 + $0x40] sm:$0xff] }
  0x12   :  { %151 = vmatpush.msra.mxu1 %v146_v5  ;;  %212 = vmatpush.msra.mxu3 %v146_v5  ;;  %v77_v11 = vld [vmem:[#allocation5 + $0x38] sm:$0xff]  ;;  %v76_v12 = vld [vmem:[#allocation5 + $0x30] sm:$0xff]  ;;  %v75_v13 = vld [vmem:[#allocation5 + $0x28] sm:$0xff] }
  0x13   :  { %92 = vmatpush.msra.mxu0 %v83_v2  ;;  %198 = vmatpush.msra.mxu2 %v83_v2  ;;  %v74_v14 = vld [vmem:[#allocation5 + $0x20] sm:$0xff]  ;;  %v73_v15 = vld [vmem:[#allocation5 + $0x18] sm:$0xff]  ;;  %v72_v16 = vld [vmem:[#allocation5 + $0x10] sm:$0xff] }
  0x14   :  { %152 = vmatpush.msra.mxu1 %v145_v6  ;;  %213 = vmatpush.msra.mxu3 %v145_v6  ;;  %v71_v17 = vld [vmem:[#allocation5 + $0x8] sm:$0xff]  ;;  %v70_v18 = vld [vmem:[#allocation5] sm:$0xff]  ;;  %v68_v19 = vld [vmem:[#allocation2] sm:$0xff] }
  0x15   :  { %93 = vmatpush.msra.mxu0 %v82_v3  ;;  %199 = vmatpush.msra.mxu2 %v82_v3  ;;  %v69_v20 = vld [vmem:[#allocation2 + $0x8] sm:$0xff]  ;;  %v143_v21 = vld [vmem:[#allocation7 + $0x60] sm:$0xff]  ;;  %v141_v23 = vld [vmem:[#allocation7 + $0x50] sm:$0xff] }
  0x16   :  { %153 = vmatpush.msra.mxu1 %v144_v8  ;;  %214 = vmatpush.msra.mxu3 %v144_v8  ;;  %v142_v22 = vld [vmem:[#allocation7 + $0x58] sm:$0xff]  ;;  %v140_v24 = vld [vmem:[#allocation7 + $0x48] sm:$0xff]  ;;  %v139_v25 = vld [vmem:[#allocation7 + $0x40] sm:$0xff] }
  0x17   :  { %94 = vmatpush.msra.mxu0 %v81_v4  ;;  %200 = vmatpush.msra.mxu2 %v81_v4  ;;  %v138_v26 = vld [vmem:[#allocation7 + $0x38] sm:$0xff]  ;;  %v137_v27 = vld [vmem:[#allocation7 + $0x30] sm:$0xff]  ;;  %v136_v28 = vld [vmem:[#allocation7 + $0x28] sm:$0xff] }
  0x18   :  { %154 = vmatpush.msra.mxu1 %v143_v21  ;;  %215 = vmatpush.msra.mxu3 %v143_v21  ;;  %v135_v29 = vld [vmem:[#allocation7 + $0x20] sm:$0xff]  ;;  %v134_v30 = vld [vmem:[#allocation7 + $0x18] sm:$0xff]  ;;  %v133_v31 = vld [vmem:[#allocation7 + $0x10] sm:$0xff] }
  0x19   :  { %95 = vmatpush.msra.mxu0 %v80_v7  ;;  %201 = vmatpush.msra.mxu2 %v80_v7  ;;  %v132_v32 = vld [vmem:[#allocation7 + $0x8] sm:$0xff]  ;;  %v131_v33 = vld [vmem:[#allocation7] sm:$0xff]  ;;  %v234_v34 = vld [vmem:[%s410_s2] ss:$0 sm:$0xff] }
  0x1a   :  { %155 = vmatpush.msra.mxu1 %v142_v22  ;;  %216 = vmatpush.msra.mxu3 %v142_v22  ;;  %v235_v57 = vld [vmem:[%s412_s4] ss:$0 sm:$0xff] }
  0x1b   :  { %96 = vmatpush.msra.mxu0 %v79_v9  ;;  %202 = vmatpush.msra.mxu2 %v79_v9 }
  0x1c   :  { %156 = vmatpush.msra.mxu1 %v141_v23  ;;  %217 = vmatpush.msra.mxu3 %v141_v23 }
  0x1d   :  { %97 = vmatpush.msra.mxu0 %v78_v10  ;;  %203 = vmatpush.msra.mxu2 %v78_v10 }
  0x1e   :  { %157 = vmatpush.msra.mxu1 %v140_v24  ;;  %218 = vmatpush.msra.mxu3 %v140_v24 }
  0x1f   :  { %98 = vmatpush.msra.mxu0 %v77_v11  ;;  %204 = vmatpush.msra.mxu2 %v77_v11 }
  0x20   :  { %158 = vmatpush.msra.mxu1 %v139_v25  ;;  %219 = vmatpush.msra.mxu3 %v139_v25 }
  0x21   :  { %99 = vmatpush.msra.mxu0 %v76_v12  ;;  %205 = vmatpush.msra.mxu2 %v76_v12 }
  0x22   :  { %159 = vmatpush.msra.mxu1 %v138_v26  ;;  %220 = vmatpush.msra.mxu3 %v138_v26 }
  0x23   :  { %100 = vmatpush.msra.mxu0 %v75_v13  ;;  %206 = vmatpush.msra.mxu2 %v75_v13 }
  0x24   :  { %160 = vmatpush.msra.mxu1 %v137_v27  ;;  %221 = vmatpush.msra.mxu3 %v137_v27 }
  0x25   :  { %101 = vmatpush.msra.mxu0 %v74_v14  ;;  %207 = vmatpush.msra.mxu2 %v74_v14 }
  0x26   :  { %161 = vmatpush.msra.mxu1 %v136_v28  ;;  %222 = vmatpush.msra.mxu3 %v136_v28 }
  0x27   :  { %102 = vmatpush.msra.mxu0 %v73_v15  ;;  %208 = vmatpush.msra.mxu2 %v73_v15 }
  0x28   :  { %162 = vmatpush.msra.mxu1 %v135_v29  ;;  %223 = vmatpush.msra.mxu3 %v135_v29 }
  0x29   :  { %103 = vmatpush.msra.mxu0 %v72_v16  ;;  %209 = vmatpush.msra.mxu2 %v72_v16 }
  0x2a   :  { %163 = vmatpush.msra.mxu1 %v134_v30  ;;  %224 = vmatpush.msra.mxu3 %v134_v30 }
  0x2b   :  { %104 = vmatpush.msra.mxu0 %v71_v17  ;;  %210 = vmatpush.msra.mxu2 %v71_v17 }
  0x2c   :  { %164 = vmatpush.msra.mxu1 %v133_v31  ;;  %225 = vmatpush.msra.mxu3 %v133_v31 }
  0x2d   :  { %105 = vmatpush.msra.mxu0 %v70_v18  ;;  %211 = vmatpush.msra.mxu2 %v70_v18 }
  0x2e   :  { %106 = vmatmul.f32.vlgmr.msra.gmra.mxu0 %v68_v19  ;;  %109 = vmatmul.f32.vlgmr.msra.gmra.mxu2 %v69_v20 }
  0x2f   :  { %165 = vmatpush.msra.mxu1 %v132_v32  ;;  %226 = vmatpush.msra.mxu3 %v132_v32 }
  0x31   :  { %166 = vmatpush.msra.mxu1 %v131_v33  ;;  %227 = vmatpush.msra.mxu3 %v131_v33 }
  0xab   :  { %v107_v35 = vpop.f32.mrf.mxu0 }
  0xac   :  { %v108_v36 = vadd.f32 %v234_v34, %v107_v35 }
  0xae   :  { %v113_v37 = vmul.f32 %v108_v36, %v108_v36 }
  0xb0   :  { %v115_v38 = vmul.f32 %v113_v37, %v108_v36 }
  0xb1   :  { %v110_v39 = vpop.f32.mrf.mxu2 }
  0xb2   :  { %v111_v40 = vadd.f32 %v234_v34, %v110_v39  ;;  %v117_v41 = vmul.f32 0.044715, %v115_v38 }
  0xb4   :  { %v114_v42 = vmul.f32 %v111_v40, %v111_v40  ;;  %v119_v43 = vadd.f32 %v117_v41, %v108_v36 }
  0xb6   :  { %v116_v44 = vmul.f32 %v114_v42, %v111_v40  ;;  %v121_v45 = vmul.f32 0.7978846, %v119_v43 }
  0xb8   :  { %236 = vtanh.f32 %v121_v45  ;;  %v118_v46 = vmul.f32 0.044715, %v116_v44 }
  0xba   :  { %v120_v47 = vadd.f32 %v118_v46, %v111_v40 }
  0xbc   :  { %v122_v48 = vmul.f32 0.7978846, %v120_v47 }
  0xbe   :  { %v237_v49 = vpop.eup %236  ;;  %238 = vtanh.f32 %v122_v48 }
  0xbf   :  { %v125_v50 = vadd.f32 1.0, %v237_v49 }
  0xc1   :  { %v127_v51 = vmul.f32 0.5, %v125_v50 }
  0xc3   :  { %v129_v52 = vmul.f32 %v127_v51, %v108_v36 }
  0xc4   :  { %v239_v53 = vpop.eup %238 }
  0xc5   :  { %167 = vmatmul.f32.vlgmr.msra.gmra.mxu1 %v129_v52  ;;  %v126_v54 = vadd.f32 1.0, %v239_v53 }
  0xc7   :  { %v128_v55 = vmul.f32 0.5, %v126_v54 }
  0xc9   :  { %v130_v56 = vmul.f32 %v128_v55, %v111_v40 }
  0xcb   :  { %170 = vmatmul.f32.vlgmr.msra.gmra.mxu3 %v130_v56 }
 0x142   :  { %v168_v58 = vpop.f32.mrf.mxu1 }
 0x143   :  { %v169_v59 = vadd.f32 %v235_v57, %v168_v58 }
 0x145   :  { %174 = vst [vmem:[#allocation8] sm:$0xff] %v169_v59 }
 0x14e   :  { %v171_v60 = vpop.f32.mrf.mxu3 }
 0x14f   :  { %v172_v61 = vadd.f32 %v235_v57, %v171_v60 }
 0x151   :  { %175 = vst [vmem:[#allocation8 + $0x8] sm:$0xff] %v172_v61 }
 0x152   :  { %188 = dma.vmem_to_hbm [thread:$0]  %s181_s11, 256, %s183_s14, [#allocation4], %s343_s26, %s343_s26, %s344_s27  }
 0x153   :  { %340 = dma.done.wait [#allocation4], 256  }
 0x154   :  { %341 = vsyncadd [#allocation4], 4294967040 }
 0x155   :  { %193 = vsyncpa [#allocation3], 1 }
 0x156   :  { %194 = vsyncpa [#allocation6], 1 }
 0x157   :  { %195 = vsyncpa [#allocation4], 1 }

// kernel: tpu_custom_call.1
= control target key start
LH: loop header
LB: loop body
LE: loop exit
PB: predicated region body
PF: predicated region fallthrough
CT: control target
= control target key end

     0   :  { %10 = vsyncpa [#allocation3], 0  ;;  %s408_s0 = inlined_call_operand.hbm [shape: f32[16,128], index: 0, kind: input, shape index: {}]   ;;  %s409_s1 = inlined_call_operand.hbm [shape: f32[128,128], index: 1, kind: input, shape index: {}]   ;;  %s410_s2 = inlined_call_operand.vmem [shape: f32[1,128], index: 2, kind: input, shape index: {}]   ;;  %s411_s3 = inlined_call_operand.hbm [shape: f32[128,128], index: 3, kind: input, shape index: {}]   ;;  %s412_s4 = inlined_call_operand.vmem [shape: f32[1,128], index: 4, kind: input, shape index: {}]   ;;  %s413_s5 = inlined_call_operand.hbm [shape: f32[16,128], index: 5, kind: output, shape index: {}]  }
   0x1   :  { %11 = vsyncpa [#allocation6], 0 }
   0x2   :  { %12 = vsyncpa [#allocation4], 0  ;;  %s30_s20 = sshll.u32 %s409_s1, 4  ;;  %s342_s21 = smov [#allocation5]   ;;  %s31_s20 = int_to_ptr.hbm [resolvable:$true] %s30_s20 }
   0x3   :  { %s32_s22 = sshll.u32 %s342_s21, 4  ;;  %s17_s25 = sshll.u32 %s408_s0, 4  ;;  %s33_s22 = int_to_ptr.vmem [resolvable:$true] %s32_s22  ;;  %s18_s25 = int_to_ptr.hbm [resolvable:$true] %s17_s25 }
   0x4   :  { %s343_s26 = smov 128   ;;  %s344_s27 = smov 8  }
   0x5   :  { %38 = dma.hbm_to_vmem [thread:$0]  %s31_s20, 2048, %s33_s22, [#allocation6], %s343_s26, %s343_s26, %s344_s27  }
   0x6   :  { %s345_s28 = smov [#allocation2]   ;;  %s45_s1 = sshll.u32 %s411_s3, 4  ;;  %s46_s1 = int_to_ptr.hbm [resolvable:$true] %s45_s1 }
   0x7   :  { %s19_s29 = sshll.u32 %s345_s28, 4  ;;  %s346_s0 = smov [#allocation7]   ;;  %s20_s29 = int_to_ptr.vmem [resolvable:$true] %s19_s29 }
   0x8   :  { %25 = dma.hbm_to_vmem [thread:$0]  %s18_s25, 256, %s20_s29, [#allocation3], %s343_s26, %s343_s26, %s344_s27  }
   0x9   :  { %s47_s7 = sshll.u32 %s346_s0, 4  ;;  %s48_s7 = int_to_ptr.vmem [resolvable:$true] %s47_s7 }
   0xa   :  { %53 = dma.hbm_to_vmem [thread:$0]  %s46_s1, 2048, %s48_s7, [#allocation6], %s343_s26, %s343_s26, %s344_s27  }
   0xb   :  { %336 = dma.done.wait [#allocation3], 256  }
   0xc   :  { %337 = vsyncadd [#allocation3], 4294967040 }
   0xd   :  { %338 = dma.done.wait [#allocation6], 4096  }
   0xe   :  { %339 = vsyncadd [#allocation6], 4294963200  ;;  %v85_v0 = vld [vmem:[#allocation5 + $0x78] sm:$0xff]  ;;  %v84_v1 = vld [vmem:[#allocation5 + $0x70] sm:$0xff]  ;;  %s347_s10 = smov [#allocation8]   ;;  %s182_s14 = sshll.u32 %s413_s5, 4  ;;  %s183_s14 = int_to_ptr.hbm [resolvable:$true] %s182_s14 }
   0xf   :  { %90 = vmatpush.msra.mxu0 %v85_v0  ;;  %196 = vmatpush.msra.mxu2 %v85_v0  ;;  %v83_v2 = vld [vmem:[#allocation5 + $0x68] sm:$0xff]  ;;  %v82_v3 = vld [vmem:[#allocation5 + $0x60] sm:$0xff]  ;;  %v81_v4 = vld [vmem:[#allocation5 + $0x58] sm:$0xff]  ;;  %s180_s11 = sshll.u32 %s347_s10, 4  ;;  %s181_s11 = int_to_ptr.vmem [resolvable:$true] %s180_s11 }
  0x10   :  { %v146_v5 = vld [vmem:[#allocation7 + $0x78] sm:$0xff]  ;;  %v145_v6 = vld [vmem:[#allocation7 + $0x70] sm:$0xff]  ;;  %v144_v8 = vld [vmem:[#allocation7 + $0x68] sm:$0xff] }
  0x11   :  { %91 = vmatpush.msra.mxu0 %v84_v1  ;;  %197 = vmatpush.msra.mxu2 %v84_v1  ;;  %v80_v7 = vld [vmem:[#allocation5 + $0x50] sm:$0xff]  ;;  %v79_v9 = vld [vmem:[#allocation5 + $0x48] sm:$0xff]  ;;  %v78_v10 = vld [vmem:[#allocation5 + $0x40] sm:$0xff] }
  0x12   :  { %151 = vmatpush.msra.mxu1 %v146_v5  ;;  %212 = vmatpush.msra.mxu3 %v146_v5  ;;  %v77_v11 = vld [vmem:[#allocation5 + $0x38] sm:$0xff]  ;;  %v76_v12 = vld [vmem:[#allocation5 + $0x30] sm:$0xff]  ;;  %v75_v13 = vld [vmem:[#allocation5 + $0x28] sm:$0xff] }
  0x13   :  { %92 = vmatpush.msra.mxu0 %v83_v2  ;;  %198 = vmatpush.msra.mxu2 %v83_v2  ;;  %v74_v14 = vld [vmem:[#allocation5 + $0x20] sm:$0xff]  ;;  %v73_v15 = vld [vmem:[#allocation5 + $0x18] sm:$0xff]  ;;  %v72_v16 = vld [vmem:[#allocation5 + $0x10] sm:$0xff] }
  0x14   :  { %152 = vmatpush.msra.mxu1 %v145_v6  ;;  %213 = vmatpush.msra.mxu3 %v145_v6  ;;  %v71_v17 = vld [vmem:[#allocation5 + $0x8] sm:$0xff]  ;;  %v70_v18 = vld [vmem:[#allocation5] sm:$0xff]  ;;  %v68_v19 = vld [vmem:[#allocation2] sm:$0xff] }
  0x15   :  { %93 = vmatpush.msra.mxu0 %v82_v3  ;;  %199 = vmatpush.msra.mxu2 %v82_v3  ;;  %v69_v20 = vld [vmem:[#allocation2 + $0x8] sm:$0xff]  ;;  %v143_v21 = vld [vmem:[#allocation7 + $0x60] sm:$0xff]  ;;  %v141_v23 = vld [vmem:[#allocation7 + $0x50] sm:$0xff] }
  0x16   :  { %153 = vmatpush.msra.mxu1 %v144_v8  ;;  %214 = vmatpush.msra.mxu3 %v144_v8  ;;  %v142_v22 = vld [vmem:[#allocation7 + $0x58] sm:$0xff]  ;;  %v140_v24 = vld [vmem:[#allocation7 + $0x48] sm:$0xff]  ;;  %v139_v25 = vld [vmem:[#allocation7 + $0x40] sm:$0xff] }
  0x17   :  { %94 = vmatpush.msra.mxu0 %v81_v4  ;;  %200 = vmatpush.msra.mxu2 %v81_v4  ;;  %v138_v26 = vld [vmem:[#allocation7 + $0x38] sm:$0xff]  ;;  %v137_v27 = vld [vmem:[#allocation7 + $0x30] sm:$0xff]  ;;  %v136_v28 = vld [vmem:[#allocation7 + $0x28] sm:$0xff] }
  0x18   :  { %154 = vmatpush.msra.mxu1 %v143_v21  ;;  %215 = vmatpush.msra.mxu3 %v143_v21  ;;  %v135_v29 = vld [vmem:[#allocation7 + $0x20] sm:$0xff]  ;;  %v134_v30 = vld [vmem:[#allocation7 + $0x18] sm:$0xff]  ;;  %v133_v31 = vld [vmem:[#allocation7 + $0x10] sm:$0xff] }
  0x19   :  { %95 = vmatpush.msra.mxu0 %v80_v7  ;;  %201 = vmatpush.msra.mxu2 %v80_v7  ;;  %v132_v32 = vld [vmem:[#allocation7 + $0x8] sm:$0xff]  ;;  %v131_v33 = vld [vmem:[#allocation7] sm:$0xff]  ;;  %v234_v34 = vld [vmem:[%s410_s2] ss:$0 sm:$0xff] }
  0x1a   :  { %155 = vmatpush.msra.mxu1 %v142_v22  ;;  %216 = vmatpush.msra.mxu3 %v142_v22  ;;  %v235_v57 = vld [vmem:[%s412_s4] ss:$0 sm:$0xff] }
  0x1b   :  { %96 = vmatpush.msra.mxu0 %v79_v9  ;;  %202 = vmatpush.msra.mxu2 %v79_v9 }
  0x1c   :  { %156 = vmatpush.msra.mxu1 %v141_v23  ;;  %217 = vmatpush.msra.mxu3 %v141_v23 }
  0x1d   :  { %97 = vmatpush.msra.mxu0 %v78_v10  ;;  %203 = vmatpush.msra.mxu2 %v78_v10 }
  0x1e   :  { %157 = vmatpush.msra.mxu1 %v140_v24  ;;  %218 = vmatpush.msra.mxu3 %v140_v24 }
  0x1f   :  { %98 = vmatpush.msra.mxu0 %v77_v11  ;;  %204 = vmatpush.msra.mxu2 %v77_v11 }
  0x20   :  { %158 = vmatpush.msra.mxu1 %v139_v25  ;;  %219 = vmatpush.msra.mxu3 %v139_v25 }
  0x21   :  { %99 = vmatpush.msra.mxu0 %v76_v12  ;;  %205 = vmatpush.msra.mxu2 %v76_v12 }
  0x22   :  { %159 = vmatpush.msra.mxu1 %v138_v26  ;;  %220 = vmatpush.msra.mxu3 %v138_v26 }
  0x23   :  { %100 = vmatpush.msra.mxu0 %v75_v13  ;;  %206 = vmatpush.msra.mxu2 %v75_v13 }
  0x24   :  { %160 = vmatpush.msra.mxu1 %v137_v27  ;;  %221 = vmatpush.msra.mxu3 %v137_v27 }
  0x25   :  { %101 = vmatpush.msra.mxu0 %v74_v14  ;;  %207 = vmatpush.msra.mxu2 %v74_v14 }
  0x26   :  { %161 = vmatpush.msra.mxu1 %v136_v28  ;;  %222 = vmatpush.msra.mxu3 %v136_v28 }
  0x27   :  { %102 = vmatpush.msra.mxu0 %v73_v15  ;;  %208 = vmatpush.msra.mxu2 %v73_v15 }
  0x28   :  { %162 = vmatpush.msra.mxu1 %v135_v29  ;;  %223 = vmatpush.msra.mxu3 %v135_v29 }
  0x29   :  { %103 = vmatpush.msra.mxu0 %v72_v16  ;;  %209 = vmatpush.msra.mxu2 %v72_v16 }
  0x2a   :  { %163 = vmatpush.msra.mxu1 %v134_v30  ;;  %224 = vmatpush.msra.mxu3 %v134_v30 }
  0x2b   :  { %104 = vmatpush.msra.mxu0 %v71_v17  ;;  %210 = vmatpush.msra.mxu2 %v71_v17 }
  0x2c   :  { %164 = vmatpush.msra.mxu1 %v133_v31  ;;  %225 = vmatpush.msra.mxu3 %v133_v31 }
  0x2d   :  { %105 = vmatpush.msra.mxu0 %v70_v18  ;;  %211 = vmatpush.msra.mxu2 %v70_v18 }
  0x2e   :  { %106 = vmatmul.f32.vlgmr.msra.gmra.mxu0 %v68_v19  ;;  %109 = vmatmul.f32.vlgmr.msra.gmra.mxu2 %v69_v20 }
  0x2f   :  { %165 = vmatpush.msra.mxu1 %v132_v32  ;;  %226 = vmatpush.msra.mxu3 %v132_v32 }
  0x31   :  { %166 = vmatpush.msra.mxu1 %v131_v33  ;;  %227 = vmatpush.msra.mxu3 %v131_v33 }
  0xab   :  { %v107_v35 = vpop.f32.mrf.mxu0 }
  0xac   :  { %v108_v36 = vadd.f32 %v234_v34, %v107_v35 }
  0xae   :  { %v113_v37 = vmul.f32 %v108_v36, %v108_v36 }
  0xb0   :  { %v115_v38 = vmul.f32 %v113_v37, %v108_v36 }
  0xb1   :  { %v110_v39 = vpop.f32.mrf.mxu2 }
  0xb2   :  { %v111_v40 = vadd.f32 %v234_v34, %v110_v39  ;;  %v117_v41 = vmul.f32 0.044715, %v115_v38 }
  0xb4   :  { %v114_v42 = vmul.f32 %v111_v40, %v111_v40  ;;  %v119_v43 = vadd.f32 %v117_v41, %v108_v36 }
  0xb6   :  { %v116_v44 = vmul.f32 %v114_v42, %v111_v40  ;;  %v121_v45 = vmul.f32 0.7978846, %v119_v43 }
  0xb8   :  { %236 = vtanh.f32 %v121_v45  ;;  %v118_v46 = vmul.f32 0.044715, %v116_v44 }
  0xba   :  { %v120_v47 = vadd.f32 %v118_v46, %v111_v40 }
  0xbc   :  { %v122_v48 = vmul.f32 0.7978846, %v120_v47 }
  0xbe   :  { %v237_v49 = vpop.eup %236  ;;  %238 = vtanh.f32 %v122_v48 }
  0xbf   :  { %v125_v50 = vadd.f32 1.0, %v237_v49 }
  0xc1   :  { %v127_v51 = vmul.f32 0.5, %v125_v50 }
  0xc3   :  { %v129_v52 = vmul.f32 %v127_v51, %v108_v36 }
  0xc4   :  { %v239_v53 = vpop.eup %238 }
  0xc5   :  { %167 = vmatmul.f32.vlgmr.msra.gmra.mxu1 %v129_v52  ;;  %v126_v54 = vadd.f32 1.0, %v239_v53 }
  0xc7   :  { %v128_v55 = vmul.f32 0.5, %v126_v54 }
  0xc9   :  { %v130_v56 = vmul.f32 %v128_v55, %v111_v40 }
  0xcb   :  { %170 = vmatmul.f32.vlgmr.msra.gmra.mxu3 %v130_v56 }
 0x142   :  { %v168_v58 = vpop.f32.mrf.mxu1 }
 0x143   :  { %v169_v59 = vadd.f32 %v235_v57, %v168_v58 }
 0x145   :  { %174 = vst [vmem:[#allocation8] sm:$0xff] %v169_v59 }
 0x14e   :  { %v171_v60 = vpop.f32.mrf.mxu3 }
 0x14f   :  { %v172_v61 = vadd.f32 %v235_v57, %v171_v60 }
 0x151   :  { %175 = vst [vmem:[#allocation8 + $0x8] sm:$0xff] %v172_v61 }
 0x152   :  { %188 = dma.vmem_to_hbm [thread:$0]  %s181_s11, 256, %s183_s14, [#allocation4], %s343_s26, %s343_s26, %s344_s27  }
 0x153   :  { %340 = dma.done.wait [#allocation4], 256  }
 0x154   :  { %341 = vsyncadd [#allocation4], 4294967040 }
 0x155   :  { %193 = vsyncpa [#allocation3], 1 }
 0x156   :  { %194 = vsyncpa [#allocation6], 1 }
 0x157   :  { %195 = vsyncpa [#allocation4], 1 }

</bundles_post_ra>
